<compile_context>
chip_gen: v6e
topology: v6e:2x2x1
jax: 0.10.0
libtpu: 0.0.40
codegen_flags: <defaults>
</compile_context>

<pallas_src>
import jax
import jax.numpy as jnp
from jax.experimental import pallas as pl
from jax.experimental.pallas import tpu as pltpu


def _bn_fc_kernel(x_ref, gamma_ref, beta_ref, w_ref, b_ref, o_ref):
    """Grid axis 0 iterates over feature (D) tiles; output block is resident."""
    k = pl.program_id(0)

    @pl.when(k == 0)
    def _():
        # Initialize the resident output block with the broadcast bias so the
        # bias add is folded into the accumulation (no scratch, no epilogue).
        o_ref[...] = jnp.broadcast_to(b_ref[...].astype(jnp.float32), o_ref.shape)

    x = x_ref[...].astype(jnp.float32)                        # (B, tk)

    # BatchNorm1d, training mode: per-feature batch mean / biased variance.
    mean = jnp.mean(x, axis=0, keepdims=True)                 # (1, tk)
    var = jnp.mean((x - mean) ** 2, axis=0, keepdims=True)    # (1, tk), biased
    x_hat = (x - mean) * jax.lax.rsqrt(var + 1e-5)
    x_bn = (x_hat * gamma_ref[...].astype(jnp.float32)
            + beta_ref[...].astype(jnp.float32))              # (B, tk)

    # Linear: accumulate partial (B, tk) @ (tk, O) directly into o_ref.
    o_ref[...] += jnp.dot(x_bn, w_ref[...].astype(jnp.float32),
                          preferred_element_type=jnp.float32)


def _pad8(n):
    return ((n + 7) // 8) * 8


def _pad128(n):
    return ((n + 127) // 128) * 128


def _choose_tk(B, D, O, tk_request, vmem_budget_bytes):
    """Pick the feature tile size.

    Preference order:
      1. Whole D in a single block if it fits the VMEM budget (no grid loop).
      2. The largest multiple of 128 (<= tk_request) that DIVIDES D and fits,
         so the wrapper never has to pad/copy x or w in HBM.
      3. Fallback: largest multiple of 128 that fits (wrapper pads D).

    The estimate is conservative: 4 bytes/element with lane/sublane padding
    (so it is never wrong for bf16 inputs either).
    """
    B8 = _pad8(B)
    O128 = _pad128(O)

    def tile_bytes(t):
        t128 = _pad128(t)
        x_tile = B8 * t128                 # x feature tile
        w_tile = _pad8(t) * O128           # weight tile (lane-padded small O)
        gb_tile = 2 * 8 * t128             # gamma + beta tiles
        bias = 8 * O128                    # resident bias
        out = B8 * O128                    # resident output block
        return 4 * (2 * (x_tile + w_tile + gb_tile) + bias + out)

    if tile_bytes(D) <= vmem_budget_bytes:
        return D                           # single block, no D padding needed

    t_max = max(128, (min(tk_request, D) // 128) * 128)

    # Prefer tiles that divide D exactly (no wrapper-side pad of x / w).
    t = t_max
    while t >= 128:
        if D % t == 0 and tile_bytes(t) <= vmem_budget_bytes:
            return t
        t -= 128

    # Fallback: largest multiple of 128 that fits the budget (wrapper pads D).
    t = t_max
    while t > 128 and tile_bytes(t) > vmem_budget_bytes:
        t -= 128
    return t


def model_forward(x, gamma, beta, w_t, b, *, tk=2048, vmem_budget_bytes=32 << 20):
    """x: (B, D) encoder features.  gamma/beta: (D,).  w_t: (D, O).  b: (O,)."""
    B, D = x.shape
    Dw, O = w_t.shape
    assert Dw == D

    tk_sel = _choose_tk(B, D, O, tk, vmem_budget_bytes)

    gamma2 = gamma.astype(jnp.float32).reshape(1, D)
    beta2 = beta.astype(jnp.float32).reshape(1, D)
    b2 = b.astype(jnp.float32).reshape(1, O)
    w2 = w_t

    d_extra = (-D) % tk_sel
    if d_extra > 0:
        # Rare fallback: zero-padded feature columns normalize to 0 and hit
        # zero weight rows, so they contribute nothing to the output.
        x = jnp.pad(x, ((0, 0), (0, d_extra)))
        gamma2 = jnp.pad(gamma2, ((0, 0), (0, d_extra)), constant_values=1.0)
        beta2 = jnp.pad(beta2, ((0, 0), (0, d_extra)))
        w2 = jnp.pad(w2, ((0, d_extra), (0, 0)))
    D_pad = D + d_extra
    n_steps = D_pad // tk_sel

    cost = pl.CostEstimate(
        flops=int(2 * B * D_pad * O + 8 * B * D_pad),
        transcendentals=int(D_pad),           # one rsqrt per feature column
        bytes_accessed=int(B * D_pad * x.dtype.itemsize
                           + D_pad * O * w2.dtype.itemsize
                           + 2 * D_pad * 4          # gamma + beta (f32)
                           + O * 4                  # bias
                           + B * O * 4),            # output
    )

    out = pl.pallas_call(
        _bn_fc_kernel,
        out_shape=jax.ShapeDtypeStruct((B, O), jnp.float32),
        grid_spec=pltpu.PrefetchScalarGridSpec(
            num_scalar_prefetch=0,
            grid=(n_steps,),
            in_specs=[
                pl.BlockSpec((B, tk_sel), lambda k: (0, k)),     # x feature tile (full batch!)
                pl.BlockSpec((1, tk_sel), lambda k: (0, k)),     # gamma tile
                pl.BlockSpec((1, tk_sel), lambda k: (0, k)),     # beta tile
                pl.BlockSpec((tk_sel, O), lambda k: (k, 0)),     # fc weight tile (transposed), un-padded O
                pl.BlockSpec((1, O), lambda k: (0, 0)),          # fc bias (resident)
            ],
            out_specs=pl.BlockSpec((B, O), lambda k: (0, 0)),    # resident accumulator, un-padded
        ),
        compiler_params=pltpu.CompilerParams(
            # Single axis is a reduction over feature tiles.
            dimension_semantics=("arbitrary",),
            # Keep the Mosaic scoped-VMEM limit consistent with the Python-side
            # tiling budget (+ headroom for compiler-internal scratch).
            vmem_limit_bytes=int(vmem_budget_bytes + (8 << 20)),
        ),
        cost_estimate=cost,
    )(x, gamma2, beta2, w2, b2)

    return out


def _reference(x, gamma, beta, w_t, b):
    x = x.astype(jnp.float32)
    mean = jnp.mean(x, axis=0, keepdims=True)
    var = jnp.mean((x - mean) ** 2, axis=0, keepdims=True)
    x_bn = (x - mean) / jnp.sqrt(var + 1e-5) * gamma[None, :] + beta[None, :]
    return jnp.dot(x_bn, w_t, precision=jax.lax.Precision.HIGHEST) + b[None, :]


if __name__ == "__main__":
    key = jax.random.PRNGKey(0)
    B, input_dim, output_dim = 8, 768, 8   # operaCT-style flattened feature dim

    keys = jax.random.split(key, 9)
    k_x, k_w, k_b, k_x2, k_w2, k_b2, k_x3, k_w3, k_b3 = keys

    # Encoder features (stand-in for encoder.extract_feature(...) output, flattened).
    x = jax.random.normal(k_x, (B, input_dim), dtype=jnp.float32)

    # BatchNorm1d default init: gamma=1, beta=0.
    gamma = jnp.ones((input_dim,), dtype=jnp.float32)
    beta = jnp.zeros((input_dim,), dtype=jnp.float32)

    # nn.Linear(input_dim, output_dim): weights stored transposed as (D, O).
    bound = 1.0 / (input_dim ** 0.5)
    w_t = jax.random.uniform(k_w, (input_dim, output_dim),
                             minval=-bound, maxval=bound, dtype=jnp.float32)
    b = jax.random.uniform(k_b, (output_dim,),
                           minval=-bound, maxval=bound, dtype=jnp.float32)

    # Main path: whole problem fits one block -> single grid step, single matmul.
    out = jax.block_until_ready(model_forward(x, gamma, beta, w_t, b))
    ref = _reference(x, gamma, beta, w_t, b)
    assert out.shape == (B, output_dim)
    assert jnp.allclose(out, ref, atol=1e-3, rtol=1e-3), "mismatch vs reference (single block)"

    # Tiled multi-step reduction path (forced small VMEM budget); the chooser
    # picks a divisor tile of D, so no wrapper-side padding/copy occurs.
    D2 = 2048
    x2 = jax.random.normal(k_x2, (B, D2), dtype=jnp.float32)
    g2 = jnp.ones((D2,), dtype=jnp.float32)
    bt2 = jnp.zeros((D2,), dtype=jnp.float32)
    bound2 = 1.0 / (D2 ** 0.5)
    w2 = jax.random.uniform(k_w2, (D2, output_dim),
                            minval=-bound2, maxval=bound2, dtype=jnp.float32)
    b2 = jax.random.uniform(k_b2, (output_dim,),
                            minval=-bound2, maxval=bound2, dtype=jnp.float32)
    out2 = jax.block_until_ready(
        model_forward(x2, g2, bt2, w2, b2, tk=2048, vmem_budget_bytes=1 << 20))
    ref2 = _reference(x2, g2, bt2, w2, b2)
    assert out2.shape == (B, output_dim)
    assert jnp.allclose(out2, ref2, atol=1e-3, rtol=1e-3), "mismatch vs reference (tiled)"

    # Ragged-D fallback path (D not a multiple of 128, budget too small for a
    # single block) -> exercises the wrapper-side padded tiling for correctness.
    D3 = 4000
    x3 = jax.random.normal(k_x3, (B, D3), dtype=jnp.float32)
    g3 = jnp.ones((D3,), dtype=jnp.float32)
    bt3 = jnp.zeros((D3,), dtype=jnp.float32)
    bound3 = 1.0 / (D3 ** 0.5)
    w3 = jax.random.uniform(k_w3, (D3, output_dim),
                            minval=-bound3, maxval=bound3, dtype=jnp.float32)
    b3 = jax.random.uniform(k_b3, (output_dim,),
                            minval=-bound3, maxval=bound3, dtype=jnp.float32)
    out3 = jax.block_until_ready(
        model_forward(x3, g3, bt3, w3, b3, tk=1024, vmem_budget_bytes=2 << 20))
    ref3 = _reference(x3, g3, bt3, w3, b3)
    assert out3.shape == (B, output_dim)
    assert jnp.allclose(out3, ref3, atol=5e-3, rtol=5e-3), "mismatch vs reference (ragged fallback)"

    print("KERNEL_OK")
</pallas_src>

<mosaic_0001>
module attributes {stable_mosaic.version = 11 : i64} {
  func.func @_bn_fc_kernel(%arg0: i32, %arg1: memref<8x768xf32, #tpu.memory_space<vmem>>, %arg2: memref<1x768xf32, #tpu.memory_space<vmem>>, %arg3: memref<1x768xf32, #tpu.memory_space<vmem>>, %arg4: memref<768x8xf32, #tpu.memory_space<vmem>>, %arg5: memref<1x8xf32, #tpu.memory_space<vmem>>, %arg6: memref<8x8xf32, #tpu.memory_space<vmem>>) attributes {dimension_semantics = [#tpu.dimension_semantics<arbitrary>], iteration_bounds = array<i64: 1>, scalar_prefetch = 0 : i64, scratch_operands = 0 : i64, tpu.core_type = #tpu.core_type<tc>, window_params = [{transform_indices = @transform_0, window_bounds = array<i64: 8, 768>}, {transform_indices = @transform_1, window_bounds = array<i64: 1, 768>}, {transform_indices = @transform_2, window_bounds = array<i64: 1, 768>}, {transform_indices = @transform_3, window_bounds = array<i64: 768, 8>}, {pipeline_mode = #tpu.pipeline_mode<synchronous>, transform_indices = @transform_4, window_bounds = array<i64: 1, 8>}, {pipeline_mode = #tpu.pipeline_mode<synchronous>, transform_indices = @transform_5, window_bounds = array<i64: 8, 8>}]} {
    %c0_i32 = arith.constant 0 : i32
    %0 = arith.cmpi eq, %arg0, %c0_i32 : i32
    %1 = arith.extui %0 : i1 to i32
    %c0_i32_0 = arith.constant 0 : i32
    %2 = arith.cmpi ne, %1, %c0_i32_0 : i32
    scf.if %2 {
      %c0_17 = arith.constant 0 : index
      %c0_18 = arith.constant 0 : index
      %33 = vector.load %arg5[%c0_17, %c0_18] : memref<1x8xf32, #tpu.memory_space<vmem>>, vector<1x8xf32>
      %34 = vector.shape_cast %33 : vector<1x8xf32> to vector<1x8xf32>
      %35 = vector.broadcast %34 : vector<1x8xf32> to vector<8x8xf32>
      %c0_19 = arith.constant 0 : index
      %c0_20 = arith.constant 0 : index
      %36 = vector.load %arg6[%c0_19, %c0_20] : memref<8x8xf32, #tpu.memory_space<vmem>>, vector<8x8xf32>
      tpu.vector_store %arg6[%c0_19, %c0_20], %35 {strides = array<i32>} : memref<8x8xf32, #tpu.memory_space<vmem>>, vector<8x8xf32>,
    } else {
    }
    %c0 = arith.constant 0 : index
    %c0_1 = arith.constant 0 : index
    %3 = vector.load %arg1[%c0, %c0_1] : memref<8x768xf32, #tpu.memory_space<vmem>>, vector<8x768xf32>
    %cst = arith.constant dense<0.000000e+00> : vector<768xf32>
    %4 = vector.multi_reduction <add>, %3, %cst [0] : vector<8x768xf32> to vector<768xf32>
    %5 = vector.shape_cast %4 : vector<768xf32> to vector<1x768xf32>
    %cst_2 = arith.constant 8.000000e+00 : f32
    %6 = vector.broadcast %cst_2 : f32 to vector<1x768xf32>
    %7 = arith.divf %5, %6 : vector<1x768xf32>
    %8 = vector.broadcast %7 : vector<1x768xf32> to vector<8x768xf32>
    %9 = arith.subf %3, %8 : vector<8x768xf32>
    %10 = arith.mulf %9, %9 : vector<8x768xf32>
    %cst_3 = arith.constant dense<0.000000e+00> : vector<768xf32>
    %11 = vector.multi_reduction <add>, %10, %cst_3 [0] : vector<8x768xf32> to vector<768xf32>
    %12 = vector.shape_cast %11 : vector<768xf32> to vector<1x768xf32>
    %cst_4 = arith.constant 8.000000e+00 : f32
    %13 = vector.broadcast %cst_4 : f32 to vector<1x768xf32>
    %14 = arith.divf %12, %13 : vector<1x768xf32>
    %15 = vector.broadcast %7 : vector<1x768xf32> to vector<8x768xf32>
    %16 = arith.subf %3, %15 : vector<8x768xf32>
    %cst_5 = arith.constant 9.99999974E-6 : f32
    %17 = vector.broadcast %cst_5 : f32 to vector<1x768xf32>
    %18 = arith.addf %14, %17 : vector<1x768xf32>
    %19 = math.rsqrt %18 : vector<1x768xf32>
    %20 = vector.broadcast %19 : vector<1x768xf32> to vector<8x768xf32>
    %21 = arith.mulf %16, %20 : vector<8x768xf32>
    %c0_6 = arith.constant 0 : index
    %c0_7 = arith.constant 0 : index
    %22 = vector.load %arg2[%c0_6, %c0_7] : memref<1x768xf32, #tpu.memory_space<vmem>>, vector<1x768xf32>
    %23 = vector.broadcast %22 : vector<1x768xf32> to vector<8x768xf32>
    %24 = arith.mulf %21, %23 : vector<8x768xf32>
    %c0_8 = arith.constant 0 : index
    %c0_9 = arith.constant 0 : index
    %25 = vector.load %arg3[%c0_8, %c0_9] : memref<1x768xf32, #tpu.memory_space<vmem>>, vector<1x768xf32>
    %26 = vector.broadcast %25 : vector<1x768xf32> to vector<8x768xf32>
    %27 = arith.addf %24, %26 : vector<8x768xf32>
    %c0_10 = arith.constant 0 : index
    %c0_11 = arith.constant 0 : index
    %28 = vector.load %arg6[%c0_10, %c0_11] : memref<8x8xf32, #tpu.memory_space<vmem>>, vector<8x8xf32>
    %c0_12 = arith.constant 0 : index
    %c0_13 = arith.constant 0 : index
    %29 = vector.load %arg4[%c0_12, %c0_13] : memref<768x8xf32, #tpu.memory_space<vmem>>, vector<768x8xf32>
    %cst_14 = arith.constant dense<0.000000e+00> : vector<8x8xf32>
    %30 = tpu.matmul %27, %29, %cst_14 {dimension_numbers = #tpu.dot_dimension_numbers<[1], [0], [0], [1], [0, 0, 1, 1], [], []>} : vector<8x768xf32>, vector<768x8xf32>, vector<8x8xf32> -> vector<8x8xf32>
    %31 = arith.addf %28, %30 : vector<8x8xf32>
    %c0_15 = arith.constant 0 : index
    %c0_16 = arith.constant 0 : index
    %32 = vector.load %arg6[%c0_15, %c0_16] : memref<8x8xf32, #tpu.memory_space<vmem>>, vector<8x8xf32>
    tpu.vector_store %arg6[%c0_15, %c0_16], %31 {strides = array<i32>} : memref<8x8xf32, #tpu.memory_space<vmem>>, vector<8x8xf32>,
    return
  }
  func.func @transform_0(%arg0: i32) -> (i32, i32) {
    %c0_i32 = arith.constant 0 : i32
    %c0_i32_0 = arith.constant 0 : i32
    return %c0_i32, %arg0 : i32, i32
  }
  func.func @transform_1(%arg0: i32) -> (i32, i32) {
    %c0_i32 = arith.constant 0 : i32
    %c0_i32_0 = arith.constant 0 : i32
    return %c0_i32, %arg0 : i32, i32
  }
  func.func @transform_2(%arg0: i32) -> (i32, i32) {
    %c0_i32 = arith.constant 0 : i32
    %c0_i32_0 = arith.constant 0 : i32
    return %c0_i32, %arg0 : i32, i32
  }
  func.func @transform_3(%arg0: i32) -> (i32, i32) {
    %c0_i32 = arith.constant 0 : i32
    %c0_i32_0 = arith.constant 0 : i32
    return %arg0, %c0_i32 : i32, i32
  }
  func.func @transform_4(%arg0: i32) -> (i32, i32) {
    %c0_i32 = arith.constant 0 : i32
    %c0_i32_0 = arith.constant 0 : i32
    %c0_i32_1 = arith.constant 0 : i32
    return %c0_i32, %c0_i32_0 : i32, i32
  }
  func.func @transform_5(%arg0: i32) -> (i32, i32) {
    %c0_i32 = arith.constant 0 : i32
    %c0_i32_0 = arith.constant 0 : i32
    %c0_i32_1 = arith.constant 0 : i32
    return %c0_i32, %c0_i32_0 : i32, i32
  }
}

</mosaic_0001>

<bundles_post_ra>
// kernel: tpu_custom_call.1
= control target key start
LH: loop header
LB: loop body
LE: loop exit
PB: predicated region body
PF: predicated region fallthrough
CT: control target
= control target key end

     0   :  { %s1121_s0 = inlined_call_operand.vmem [shape: f32[8,768], index: 0, kind: input, shape index: {}]   ;;  %s1122_s1 = inlined_call_operand.vmem [shape: f32[1,768], index: 1, kind: input, shape index: {}]   ;;  %s1123_s2 = inlined_call_operand.vmem [shape: f32[1,768], index: 2, kind: input, shape index: {}]   ;;  %s1124_s3 = inlined_call_operand.vmem [shape: f32[768,8], index: 3, kind: input, shape index: {}]   ;;  %s1125_s4 = inlined_call_operand.vmem [shape: f32[1,8], index: 4, kind: input, shape index: {}]   ;;  %s1126_s5 = inlined_call_operand.hbm [shape: f32[8,8], index: 5, kind: output, shape index: {}]  }
   0x1   :  { %v263_v0 = vld [vmem:[%s1124_s3 + $0xf8] sm:$0xff]  ;;  %v262_v3 = vld [vmem:[%s1124_s3 + $0xf0] sm:$0xff]  ;;  %v261_v7 = vld [vmem:[%s1124_s3 + $0xe8] sm:$0xff] }
   0x2   :  { %v247_v1 = vld [vmem:[%s1124_s3 + $0x78] sm:$0xff]  ;;  %556 = vmatprep.subr.mxu0 %v263_v0  ;;  %v246_v5 = vld [vmem:[%s1124_s3 + $0x70] sm:$0xff]  ;;  %v245_v9 = vld [vmem:[%s1124_s3 + $0x68] sm:$0xff] }
   0x3   :  { %v295_v2 = vld [vmem:[%s1124_s3 + $0x1f8] sm:$0xff]  ;;  %557 = vmatpush3.msra.mxu0 %v247_v1  ;;  %v294_v6 = vld [vmem:[%s1124_s3 + $0x1f0] sm:$0xff]  ;;  %v293_v10 = vld [vmem:[%s1124_s3 + $0x1e8] sm:$0xff] }
   0x4   :  { %591 = vmatprep.subr.mxu1 %v295_v2  ;;  %v279_v4 = vld [vmem:[%s1124_s3 + $0x178] sm:$0xff]  ;;  %v278_v8 = vld [vmem:[%s1124_s3 + $0x170] sm:$0xff]  ;;  %558 = vmatprep.subr.mxu0 %v262_v3  ;;  %v260_v11 = vld [vmem:[%s1124_s3 + $0xe0] sm:$0xff] }
   0x5   :  { %592 = vmatpush3.msra.mxu1 %v279_v4  ;;  %559 = vmatpush3.msra.mxu0 %v246_v5  ;;  %v277_v12 = vld [vmem:[%s1124_s3 + $0x168] sm:$0xff]  ;;  %v292_v13 = vld [vmem:[%s1124_s3 + $0x1e0] sm:$0xff]  ;;  %v259_v16 = vld [vmem:[%s1124_s3 + $0xd8] sm:$0xff] }
   0x6   :  { %593 = vmatprep.subr.mxu1 %v294_v6  ;;  %560 = vmatprep.subr.mxu0 %v261_v7  ;;  %v244_v14 = vld [vmem:[%s1124_s3 + $0x60] sm:$0xff]  ;;  %v291_v17 = vld [vmem:[%s1124_s3 + $0x1d8] sm:$0xff]  ;;  %v258_v20 = vld [vmem:[%s1124_s3 + $0xd0] sm:$0xff] }
   0x7   :  { %594 = vmatpush3.msra.mxu1 %v278_v8  ;;  %v276_v15 = vld [vmem:[%s1124_s3 + $0x160] sm:$0xff]  ;;  %561 = vmatpush3.msra.mxu0 %v245_v9  ;;  %v243_v18 = vld [vmem:[%s1124_s3 + $0x58] sm:$0xff]  ;;  %v290_v21 = vld [vmem:[%s1124_s3 + $0x1d0] sm:$0xff] }
   0x8   :  { %595 = vmatprep.subr.mxu1 %v293_v10  ;;  %562 = vmatprep.subr.mxu0 %v260_v11  ;;  %v275_v19 = vld [vmem:[%s1124_s3 + $0x158] sm:$0xff]  ;;  %v242_v22 = vld [vmem:[%s1124_s3 + $0x50] sm:$0xff]  ;;  %v257_v24 = vld [vmem:[%s1124_s3 + $0xc8] sm:$0xff] }
   0x9   :  { %596 = vmatpush3.msra.mxu1 %v277_v12  ;;  %563 = vmatpush3.msra.mxu0 %v244_v14  ;;  %v274_v23 = vld [vmem:[%s1124_s3 + $0x150] sm:$0xff]  ;;  %v289_v25 = vld [vmem:[%s1124_s3 + $0x1c8] sm:$0xff]  ;;  %v256_v28 = vld [vmem:[%s1124_s3 + $0xc0] sm:$0xff] }
   0xa   :  { %597 = vmatprep.subr.mxu1 %v292_v13  ;;  %564 = vmatprep.subr.mxu0 %v259_v16  ;;  %v241_v26 = vld [vmem:[%s1124_s3 + $0x48] sm:$0xff]  ;;  %v288_v29 = vld [vmem:[%s1124_s3 + $0x1c0] sm:$0xff]  ;;  %v255_v32 = vld [vmem:[%s1124_s3 + $0xb8] sm:$0xff] }
   0xb   :  { %598 = vmatpush3.msra.mxu1 %v276_v15  ;;  %565 = vmatpush3.msra.mxu0 %v243_v18  ;;  %v273_v27 = vld [vmem:[%s1124_s3 + $0x148] sm:$0xff]  ;;  %v240_v30 = vld [vmem:[%s1124_s3 + $0x40] sm:$0xff]  ;;  %v287_v33 = vld [vmem:[%s1124_s3 + $0x1b8] sm:$0xff] }
   0xc   :  { %599 = vmatprep.subr.mxu1 %v291_v17  ;;  %566 = vmatprep.subr.mxu0 %v258_v20  ;;  %v272_v31 = vld [vmem:[%s1124_s3 + $0x140] sm:$0xff]  ;;  %v239_v34 = vld [vmem:[%s1124_s3 + $0x38] sm:$0xff]  ;;  %v254_v36 = vld [vmem:[%s1124_s3 + $0xb0] sm:$0xff] }
   0xd   :  { %600 = vmatpush3.msra.mxu1 %v275_v19  ;;  %567 = vmatpush3.msra.mxu0 %v242_v22  ;;  %v271_v35 = vld [vmem:[%s1124_s3 + $0x138] sm:$0xff]  ;;  %v286_v37 = vld [vmem:[%s1124_s3 + $0x1b0] sm:$0xff]  ;;  %v253_v40 = vld [vmem:[%s1124_s3 + $0xa8] sm:$0xff] }
   0xe   :  { %601 = vmatprep.subr.mxu1 %v290_v21  ;;  %568 = vmatprep.subr.mxu0 %v257_v24  ;;  %v238_v38 = vld [vmem:[%s1124_s3 + $0x30] sm:$0xff]  ;;  %v285_v41 = vld [vmem:[%s1124_s3 + $0x1a8] sm:$0xff]  ;;  %v252_v44 = vld [vmem:[%s1124_s3 + $0xa0] sm:$0xff] }
   0xf   :  { %602 = vmatpush3.msra.mxu1 %v274_v23  ;;  %569 = vmatpush3.msra.mxu0 %v241_v26  ;;  %v270_v39 = vld [vmem:[%s1124_s3 + $0x130] sm:$0xff]  ;;  %v237_v42 = vld [vmem:[%s1124_s3 + $0x28] sm:$0xff]  ;;  %v236_v45 = vld [vmem:[%s1124_s3 + $0x20] sm:$0xff] }
  0x10   :  { %603 = vmatprep.subr.mxu1 %v289_v25  ;;  %570 = vmatprep.subr.mxu0 %v256_v28  ;;  %v269_v43 = vld [vmem:[%s1124_s3 + $0x128] sm:$0xff]  ;;  %v284_v46 = vld [vmem:[%s1124_s3 + $0x1a0] sm:$0xff]  ;;  %v251_v47 = vld [vmem:[%s1124_s3 + $0x98] sm:$0xff] }
  0x11   :  { %604 = vmatpush3.msra.mxu1 %v273_v27  ;;  %571 = vmatpush3.msra.mxu0 %v240_v30  ;;  %v268_v48 = vld [vmem:[%s1124_s3 + $0x120] sm:$0xff]  ;;  %v877_v49 = vld [vmem:[%s1121_s0 + $0x8] sm:$0xff]  ;;  %v235_v50 = vld [vmem:[%s1124_s3 + $0x18] sm:$0xff] }
  0x12   :  { %605 = vmatprep.subr.mxu1 %v288_v29  ;;  %572 = vmatprep.subr.mxu0 %v255_v32  ;;  %v283_v51 = vld [vmem:[%s1124_s3 + $0x198] sm:$0xff]  ;;  %v46_v52 = vrot.slane %v877_v49, 4  ;;  %v898_v56 = vld [vmem:[%s1121_s0] sm:$0xff]  ;;  %v903_v57 = vld [vmem:[%s1121_s0 + $0x10] sm:$0xff] }
  0x13   :  { %606 = vmatpush3.msra.mxu1 %v272_v31  ;;  %573 = vmatpush3.msra.mxu0 %v239_v34  ;;  %v889_v53 = vld [vmem:[%s1121_s0 + $0x18] sm:$0xff]  ;;  %v250_v58 = vld [vmem:[%s1124_s3 + $0x90] sm:$0xff]  ;;  %v40_v61 = vrot.slane %v898_v56, 4  ;;  %v52_v62 = vrot.slane %v903_v57, 4  ;;  %v249_v2 = vld [vmem:[%s1124_s3 + $0x88] sm:$0xff] }
  0x14   :  { %607 = vmatprep.subr.mxu1 %v287_v33  ;;  %574 = vmatprep.subr.mxu0 %v254_v36  ;;  %v267_v54 = vld [vmem:[%s1124_s3 + $0x118] sm:$0xff]  ;;  %v58_v55 = vrot.slane %v889_v53, 4  ;;  %v282_v59 = vld [vmem:[%s1124_s3 + $0x190] sm:$0xff]  ;;  %v47_v60 = vadd.f32 %v46_v52, %v877_v49  ;;  %v281_v3 = vld [vmem:[%s1124_s3 + $0x188] sm:$0xff] }
  0x15   :  { %608 = vmatpush3.msra.mxu1 %v271_v35  ;;  %575 = vmatpush3.msra.mxu0 %v238_v38  ;;  %v234_v63 = vld [vmem:[%s1124_s3 + $0x10] sm:$0xff]  ;;  %v41_v5 = vadd.f32 %v40_v61, %v898_v56  ;;  %v53_v6 = vadd.f32 %v52_v62, %v903_v57  ;;  %v233_v7 = vld [vmem:[%s1124_s3 + $0x8] sm:$0xff]  ;;  %v248_v10 = vld [vmem:[%s1124_s3 + $0x80] sm:$0xff] }
  0x16   :  { %609 = vmatprep.subr.mxu1 %v286_v37  ;;  %576 = vmatprep.subr.mxu0 %v253_v40  ;;  %v266_v0 = vld [vmem:[%s1124_s3 + $0x110] sm:$0xff]  ;;  %v59_v1 = vadd.f32 %v58_v55, %v889_v53  ;;  %v48_v4 = vrot.slane %v47_v60, 2  ;;  %v265_v8 = vld [vmem:[%s1124_s3 + $0x108] sm:$0xff]  ;;  %v280_v11 = vld [vmem:[%s1124_s3 + $0x180] sm:$0xff] }
  0x17   :  { %610 = vmatpush3.msra.mxu1 %v270_v39  ;;  %577 = vmatpush3.msra.mxu0 %v237_v42  ;;  %v42_v13 = vrot.slane %v41_v5, 2  ;;  %v54_v14 = vrot.slane %v53_v6, 2  ;;  %v232_v15 = vld [vmem:[%s1124_s3] sm:$0xff]  ;;  %v327_v19 = vld [vmem:[%s1124_s3 + $0x2f8] sm:$0xff]  ;;  %v39_v30 = vld [vmem:[%s1121_s0 + $0x28] sm:$0xff] }
  0x18   :  { %611 = vmatprep.subr.mxu1 %v285_v41  ;;  %578 = vmatprep.subr.mxu0 %v252_v44  ;;  %v60_v9 = vrot.slane %v59_v1, 2  ;;  %v49_v12 = vadd.f32 %v48_v4, %v47_v60  ;;  %v264_v16 = vld [vmem:[%s1124_s3 + $0x100] sm:$0xff] }
  0x19   :  { %612 = vmatpush3.msra.mxu1 %v269_v43  ;;  %579 = vmatpush3.msra.mxu0 %v236_v45  ;;  %v43_v20 = vadd.f32 %v42_v13, %v41_v5  ;;  %v55_v21 = vadd.f32 %v54_v14, %v53_v6  ;;  %v38_v31 = vld [vmem:[%s1121_s0 + $0x20] sm:$0xff] }
  0x1a   :  { %613 = vmatprep.subr.mxu1 %v284_v46  ;;  %580 = vmatprep.subr.mxu0 %v251_v47  ;;  %v61_v17 = vadd.f32 %v60_v9, %v59_v1  ;;  %v50_v18 = vrot.slane %v49_v12, 1 }
  0x1b   :  { %614 = vmatpush3.msra.mxu1 %v268_v48  ;;  %581 = vmatpush3.msra.mxu0 %v235_v50  ;;  %v44_v24 = vrot.slane %v43_v20, 1  ;;  %v56_v25 = vrot.slane %v55_v21, 1 }
  0x1c   :  { %615 = vmatprep.subr.mxu1 %v283_v51  ;;  %582 = vmatprep.subr.mxu0 %v250_v58  ;;  %v62_v22 = vrot.slane %v61_v17, 1  ;;  %v51_v23 = vadd.f32 %v50_v18, %v49_v12 }
  0x1d   :  { %616 = vmatpush3.msra.mxu1 %v267_v54  ;;  %583 = vmatpush3.msra.mxu0 %v234_v63  ;;  %v45_v28 = vadd.f32 %v44_v24, %v43_v20  ;;  %v57_v29 = vadd.f32 %v56_v25, %v55_v21 }
  0x1e   :  { %617 = vmatprep.subr.mxu1 %v282_v59  ;;  %584 = vmatprep.subr.mxu0 %v249_v2  ;;  %v63_v26 = vadd.f32 %v62_v22, %v61_v17  ;;  %v78_v27 = vmul.f32 0.125, %v51_v23 }
  0x1f   :  { %618 = vmatpush3.msra.mxu1 %v266_v0  ;;  %585 = vmatpush3.msra.mxu0 %v233_v7 }
  0x20   :  { %619 = vmatprep.subr.mxu1 %v281_v3  ;;  %586 = vmatprep.subr.mxu0 %v248_v10 }
  0x21   :  { %620 = vmatpush3.msra.mxu1 %v265_v8  ;;  %587 = vmatpush3.msra.mxu0 %v232_v15 }
  0x22   :  { %621 = vmatprep.subr.mxu1 %v280_v11  ;;  %626 = vmatprep.subr.mxu0 %v327_v19 }
  0x23   :  { %622 = vmatpush3.msra.mxu1 %v264_v16 }
  0x24   :  { %10 = vsyncpa [#allocation3], 0  ;;  %v80_v32 = vmul.f32 0.125, %v63_v26  ;;  %v70_v33 = vrot.slane %v39_v30, 4  ;;  %v64_v34 = vrot.slane %v38_v31, 4  ;;  %v957_v35 = vsub.f32 %v877_v49, %v78_v27 }
  0x25   :  { %v77_v36 = vmul.f32 0.125, %v45_v28  ;;  %v79_v37 = vmul.f32 0.125, %v57_v29  ;;  %vm32_vm0 = vcmask 64512  }
  0x26   :  { %v960_v38 = vsub.f32 %v889_v53, %v80_v32  ;;  %v71_v39 = vadd.f32 %v70_v33, %v39_v30  ;;  %v65_v40 = vadd.f32 %v64_v34, %v38_v31  ;;  %v90_v41 = vmul.f32 %v957_v35, %v957_v35 }
  0x27   :  { %v965_v42 = vsub.f32 %v898_v56, %v77_v36  ;;  %v968_v43 = vsub.f32 %v903_v57, %v79_v37 }
  0x28   :  { %v92_v44 = vmul.f32 %v960_v38, %v960_v38  ;;  %v72_v45 = vrot.slane %v71_v39, 2  ;;  %v66_v46 = vrot.slane %v65_v40, 2  ;;  %v101_v47 = vrot.slane %v90_v41, 4 }
  0x29   :  { %v89_v48 = vmul.f32 %v965_v42, %v965_v42  ;;  %v91_v49 = vmul.f32 %v968_v43, %v968_v43 }
  0x2a   :  { %v113_v50 = vrot.slane %v92_v44, 4  ;;  %v73_v51 = vadd.f32 %v72_v45, %v71_v39  ;;  %v67_v52 = vadd.f32 %v66_v46, %v65_v40  ;;  %v102_v53 = vadd.f32 %v101_v47, %v90_v41  ;;  %v990_v46 = vld [vmem:[%s1122_s1] sm:$0x3f] }
  0x2b   :  { %v95_v54 = vrot.slane %v89_v48, 4  ;;  %v107_v55 = vrot.slane %v91_v49, 4 }
  0x2c   :  { %v114_v56 = vadd.f32 %v113_v50, %v92_v44  ;;  %v74_v57 = vrot.slane %v73_v51, 1  ;;  %v68_v58 = vrot.slane %v67_v52, 1  ;;  %v103_v59 = vrot.slane %v102_v53, 2 }
  0x2d   :  { %v96_v60 = vadd.f32 %v95_v54, %v89_v48  ;;  %v108_v61 = vadd.f32 %v107_v55, %v91_v49 }
  0x2e   :  { %v115_v62 = vrot.slane %v114_v56, 2  ;;  %v75_v63 = vadd.f32 %v74_v57, %v73_v51  ;;  %v69_v0 = vadd.f32 %v68_v58, %v67_v52  ;;  %v104_v1 = vadd.f32 %v103_v59, %v102_v53  ;;  %v997_v51 = vld [vmem:[%s1123_s2] sm:$0x3f] }
  0x2f   :  { %v97_v2 = vrot.slane %v96_v60, 2  ;;  %v109_v3 = vrot.slane %v108_v61, 2 }
  0x30   :  { %v116_v4 = vadd.f32 %v115_v62, %v114_v56  ;;  %v82_v5 = vmul.f32 0.125, %v75_v63  ;;  %v81_v6 = vmul.f32 0.125, %v69_v0  ;;  %v105_v7 = vrot.slane %v104_v1, 1 }
  0x31   :  { %v98_v8 = vadd.f32 %v97_v2, %v96_v60  ;;  %v110_v9 = vadd.f32 %v109_v3, %v108_v61 }
  0x32   :  { %v117_v10 = vrot.slane %v116_v4, 1  ;;  %v976_v11 = vsub.f32 %v39_v30, %v82_v5  ;;  %v978_v12 = vsub.f32 %v38_v31, %v81_v6  ;;  %v106_v13 = vadd.f32 %v105_v7, %v104_v1 }
  0x33   :  { %v99_v14 = vrot.slane %v98_v8, 1  ;;  %v111_v15 = vrot.slane %v110_v9, 1  ;;  %v157_v31 = vlaneseq }
  0x34   :  { %v118_v16 = vadd.f32 %v117_v10, %v116_v4  ;;  %v94_v17 = vmul.f32 %v976_v11, %v976_v11  ;;  %v93_v18 = vmul.f32 %v978_v12, %v978_v12  ;;  %v132_v19 = vmul.f32 0.125, %v106_v13 }
  0x35   :  { %v100_v20 = vadd.f32 %v99_v14, %v98_v8  ;;  %v112_v21 = vadd.f32 %v111_v15, %v110_v9  ;;  %v984_v39 = vshrl.u32 %v157_v31, 7  ;;  %v311_v15 = vld [vmem:[%s1124_s3 + $0x278] sm:$0xff]  ;;  %v306_v31 = vld [vmem:[%s1124_s3 + $0x250] sm:$0xff] }
  0x36   :  { %v134_v22 = vmul.f32 0.125, %v118_v16  ;;  %v125_v23 = vrot.slane %v94_v17, 4  ;;  %v119_v24 = vrot.slane %v93_v18, 4  ;;  %v138_v25 = vadd.f32 1e-05, %v132_v19  ;;  %v326_v16 = vld [vmem:[%s1124_s3 + $0x2f0] sm:$0xff] }
  0x37   :  { %v131_v26 = vmul.f32 0.125, %v100_v20  ;;  %v133_v27 = vmul.f32 0.125, %v112_v21  ;;  %v163_v45 = vsub.s32 1, %v984_v39  ;;  %v171_v47 = vsub.s32 3, %v984_v39  ;;  %v325_v19 = vld [vmem:[%s1124_s3 + $0x2e8] sm:$0xff]  ;;  %v324_v21 = vld [vmem:[%s1124_s3 + $0x2e0] sm:$0xff] }
  0x38   :  { %v140_v28 = vadd.f32 1e-05, %v134_v22  ;;  %v126_v29 = vadd.f32 %v125_v23, %v94_v17  ;;  %v120_v30 = vadd.f32 %v119_v24, %v93_v18  ;;  %662 = vrsqrt.f32 %v138_v25  ;;  %v310_v17 = vld [vmem:[%s1124_s3 + $0x270] sm:$0xff]  ;;  %v309_v20 = vld [vmem:[%s1124_s3 + $0x268] sm:$0xff]  ;;  %v308_v24 = vld [vmem:[%s1124_s3 + $0x260] sm:$0xff] }
  0x39   :  { %v137_v32 = vadd.f32 1e-05, %v131_v26  ;;  %v139_v33 = vadd.f32 1e-05, %v133_v27  ;;  %v159_v49 = vsub.s32 0, %v984_v39  ;;  %v167_v52 = vsub.s32 2, %v984_v39 }
  0x3a   :  { %664 = vrsqrt.f32 %v140_v28  ;;  %v127_v34 = vrot.slane %v126_v29, 2  ;;  %v121_v36 = vrot.slane %v120_v30, 2  ;;  %v164_v54 = vrot.slane %v990_v46, %v163_v45  ;;  %v323_v25 = vld [vmem:[%s1124_s3 + $0x2d8] sm:$0xff] }
  0x3b   :  { %666 = vrsqrt.f32 %v137_v32  ;;  %v172_v56 = vrot.slane %v990_v46, %v171_v47  ;;  %v202_v59 = vrot.slane %v997_v51, %v163_v45  ;;  %v160_v60 = vrot.slane %v990_v46, %v159_v49  ;;  %v307_v28 = vld [vmem:[%s1124_s3 + $0x258] sm:$0xff] }
  0x3c   :  { %668 = vrsqrt.f32 %v139_v33  ;;  %v128_v37 = vadd.f32 %v127_v34, %v126_v29  ;;  %v122_v41 = vadd.f32 %v121_v36, %v120_v30  ;;  %v210_v0 = vrot.slane %v997_v51, %v171_v47  ;;  %v322_v29 = vld [vmem:[%s1124_s3 + $0x2d0] sm:$0xff]  ;;  %v305_v33 = vld [vmem:[%s1124_s3 + $0x248] sm:$0xff]  ;;  %v320_v34 = vld [vmem:[%s1124_s3 + $0x2c0] sm:$0xff] }
  0x3d   :  { %v168_v1 = vrot.slane %v990_v46, %v167_v52  ;;  %v198_v5 = vrot.slane %v997_v51, %v159_v49  ;;  %v206_v7 = vrot.slane %v997_v51, %v167_v52  ;;  %v304_v36 = vld [vmem:[%s1124_s3 + $0x240] sm:$0xff]  ;;  %v175_v45 = vsub.s32 4, %v984_v39  ;;  %v301_v49 = vld [vmem:[%s1124_s3 + $0x228] sm:$0xff] }
  0x3e   :  { %v129_v40 = vrot.slane %v128_v37, 1  ;;  %v123_v50 = vrot.slane %v122_v41, 1 }
  0x40   :  { %v130_v44 = vadd.f32 %v129_v40, %v128_v37  ;;  %v124_v61 = vadd.f32 %v123_v50, %v122_v41  ;;  %v319_v37 = vld [vmem:[%s1124_s3 + $0x2b8] sm:$0xff]  ;;  %v318_v41 = vld [vmem:[%s1124_s3 + $0x2b0] sm:$0xff]  ;;  %v316_v50 = vld [vmem:[%s1124_s3 + $0x2a0] sm:$0xff] }
  0x41   :  { %v303_v40 = vld [vmem:[%s1124_s3 + $0x238] sm:$0xff] }
  0x42   :  { %v136_v48 = vmul.f32 0.125, %v130_v44  ;;  %v135_v10 = vmul.f32 0.125, %v124_v61  ;;  %v302_v44 = vld [vmem:[%s1124_s3 + $0x230] sm:$0xff] }
  0x44   :  { %v142_v53 = vadd.f32 1e-05, %v136_v48  ;;  %v141_v18 = vadd.f32 1e-05, %v135_v10  ;;  %v317_v48 = vld [vmem:[%s1124_s3 + $0x2a8] sm:$0xff] }
  0x45   :  { %v663_v55 = vpop.eup %662 }
  0x46   :  { %670 = vrsqrt.f32 %v142_v53  ;;  %v150_v58 = vmul.f32 %v663_v55, %v957_v35  ;;  %v176_v53 = vrot.slane %v990_v46, %v175_v45  ;;  %v299_v55 = vld [vmem:[%s1124_s3 + $0x218] sm:$0xff] }
  0x47   :  { %v665_v57 = vpop.eup %664  ;;  %672 = vrsqrt.f32 %v141_v18 }
  0x48   :  { %v667_v62 = vpop.eup %666  ;;  %v152_v63 = vmul.f32 %v665_v57, %v960_v38  ;;  %v188_v3 = vmul.f32 %v164_v54, %v150_v58  ;;  %v315_v54 = vld [vmem:[%s1124_s3 + $0x298] sm:$0xff]  ;;  %v214_v57 = vrot.slane %v997_v51, %v175_v45  ;;  %v313_v58 = vld [vmem:[%s1124_s3 + $0x288] sm:$0xff] }
  0x49   :  { %v669_v2 = vpop.eup %668  ;;  %v149_v4 = vmul.f32 %v667_v62, %v965_v42  ;;  %v555_v62 = vld [vmem:[%s1125_s4] ss:$0 sm:$0xff] }
  0x4a   :  { %v190_v6 = vmul.f32 %v172_v56, %v152_v63  ;;  %v151_v35 = vmul.f32 %v669_v2, %v968_v43  ;;  %v226_v8 = vadd.f32 %v202_v59, %v188_v3  ;;  %v179_v43 = vsub.s32 5, %v984_v39  ;;  %v300_v39 = vld [vmem:[%s1124_s3 + $0x220] sm:$0xff]  ;;  %v314_v56 = vld [vmem:[%s1124_s3 + $0x290] sm:$0xff]  ;;  %v297_v59 = vld [vmem:[%s1124_s3 + $0x208] sm:$0xff]  ;;  %33 = vst.msk [vmem:[#allocation2] sm:$0xff] %vm32_vm0, %v555_v62 }
  0x4b   :  { %v187_v9 = vmul.f32 %v160_v60, %v149_v4  ;;  %v312_v60 = vld [vmem:[%s1124_s3 + $0x280] sm:$0xff] }
  0x4c   :  { %v228_v13 = vadd.f32 %v210_v0, %v190_v6  ;;  %v189_v38 = vmul.f32 %v168_v1, %v151_v35  ;;  %392 = vmatprep.mubr.f32.mxu0 %v226_v8  ;;  %v180_v22 = vrot.slane %v990_v46, %v179_v43  ;;  %v218_v27 = vrot.slane %v997_v51, %v179_v43  ;;  %v296_v51 = vld [vmem:[%s1124_s3 + $0x200] sm:$0xff] }
  0x4d   :  { %v225_v14 = vadd.f32 %v198_v5, %v187_v9 }
  0x4e   :  { %462 = vmatprep.mubr.f32.mxu1 %v228_v13  ;;  %v227_v42 = vadd.f32 %v206_v7, %v189_v38 }
  0x4f   :  { %393 = vmatmul.mubr.f32.vlgmr.msra.gmra.mxu0 %v225_v14 }
  0x50   :  { %463 = vmatmul.mubr.f32.vlgmr.msra.gmra.mxu1 %v227_v42  ;;  %627 = vmatpush3.msra.mxu0 %v311_v15 }
  0x51   :  { %628 = vmatprep.subr.mxu0 %v326_v16  ;;  %v231_v8 = vld [vmem:[#allocation2] sm:$0xff] }
  0x52   :  { %629 = vmatpush3.msra.mxu0 %v310_v17 }
  0x53   :  { %v671_v23 = vpop.eup %670  ;;  %630 = vmatprep.subr.mxu0 %v325_v19 }
  0x54   :  { %631 = vmatpush3.msra.mxu0 %v309_v20  ;;  %v154_v26 = vmul.f32 %v671_v23, %v976_v11  ;;  %v321_v11 = vld [vmem:[%s1124_s3 + $0x2c8] sm:$0xff]  ;;  %v673_v47 = vpop.eup %672 }
  0x55   :  { %632 = vmatprep.subr.mxu0 %v324_v21  ;;  %v153_v52 = vmul.f32 %v673_v47, %v978_v12  ;;  %v298_v12 = vld [vmem:[%s1124_s3 + $0x210] sm:$0xff]  ;;  %s696_s3 = smov [#allocation2]  }
  0x56   :  { %633 = vmatpush3.msra.mxu0 %v308_v24  ;;  %v192_v30 = vmul.f32 %v180_v22, %v154_v26  ;;  %s547_s19 = sshll.u32 %s696_s3, 4  ;;  %s548_s19 = int_to_ptr.vmem [resolvable:$true] %s547_s19 }
  0x57   :  { %634 = vmatprep.subr.mxu0 %v323_v25  ;;  %v191_v46 = vmul.f32 %v176_v53, %v153_v52  ;;  %s674_s4 = scalar_lea.vmem %s548_s19, 128  ;;  %p679_p1 = scmp.lt.s32.totalorder %s548_s19, %s548_s19 }
  0x58   :  { %635 = vmatpush3.msra.mxu0 %v307_v28  ;;  %v230_v32 = vadd.f32 %v218_v27, %v192_v30  ;;  %p675_p0 = scmp.ne.s32.totalorder %s548_s19, %s674_s4  ;;  %p680_p2 = scmp.lt.s32.totalorder %s674_s4, %s674_s4 }
  0x59   :  { %636 = vmatprep.subr.mxu0 %v322_v29  ;;  %v229_v61 = vadd.f32 %v214_v57, %v191_v46 }
  0x5a   :  { %637 = vmatpush3.msra.mxu0 %v306_v31  ;;  %532 = vmatprep.mubr.f32.mxu0 %v230_v32  ;;  %p681_p3 = por %p680_p2, %p679_p1 }
  0x5b   :  { %638 = vmatprep.subr.mxu0 %v321_v11 }
  0x5c   :  { %639 = vmatpush3.msra.mxu0 %v305_v33  ;;  %p682_p4 = pnand %p681_p3, %p675_p0 }
  0x5d   :  { %640 = vmatprep.subr.mxu0 %v320_v34 }
  0x5e   :  { %641 = vmatpush3.msra.mxu0 %v304_v36 }
  0x5f   :  { %642 = vmatprep.subr.mxu0 %v319_v37 }
  0x60   :  { %643 = vmatpush3.msra.mxu0 %v303_v40 }
  0x61   :  { %644 = vmatprep.subr.mxu0 %v318_v41 }
  0x62   :  { %645 = vmatpush3.msra.mxu0 %v302_v44 }
  0x63   :  { %646 = vmatprep.subr.mxu0 %v317_v48 }
  0x64   :  { %647 = vmatpush3.msra.mxu0 %v301_v49 }
  0x65   :  { %648 = vmatprep.subr.mxu0 %v316_v50 }
  0x66   :  { %649 = vmatpush3.msra.mxu0 %v300_v39 }
  0x67   :  { %650 = vmatprep.subr.mxu0 %v315_v54 }
  0x68   :  { %651 = vmatpush3.msra.mxu0 %v299_v55 }
  0x69   :  { %652 = vmatprep.subr.mxu0 %v314_v56 }
  0x6a   :  { %653 = vmatpush3.msra.mxu0 %v298_v12 }
  0x6b   :  { %654 = vmatprep.subr.mxu0 %v313_v58 }
  0x6c   :  { %655 = vmatpush3.msra.mxu0 %v297_v59 }
  0x6d   :  { %656 = vmatprep.subr.mxu0 %v312_v60 }
  0x6e   :  { %657 = vmatpush3.msra.mxu0 %v296_v51 }
  0x6f   :  { %533 = vmatmul.mubr.f32.vlgmr.msra.gmra.mxu0 %v229_v61 }
 0x10f   :  { %v588_v63 = vpop.f32.mrf.mxu0 }
 0x110   :  { %v623_v0 = vpop.f32.mrf.mxu1 }
 0x111   :  { %v589_v1 = vpop.f32.mrf.mxu0 }
 0x112   :  { %v624_v2 = vpop.f32.mrf.mxu1  ;;  %v590_v3 = vadd.f32 %v589_v1, %v588_v63 }
 0x113   :  { %v625_v4 = vadd.f32 %v624_v2, %v623_v0 }
 0x115   :  { %v465_v35 = vadd.f32 %v625_v4, %v590_v3 }
 0x12f   :  { %v658_v5 = vpop.f32.mrf.mxu0 }
 0x131   :  { %v659_v6 = vpop.f32.mrf.mxu0 }
 0x132   :  { %v660_v7 = vadd.f32 %v659_v6, %v658_v5 }
 0x134   :  { %v535_v9 = vadd.f32 %v660_v7, %v465_v35 }
 0x136   :  { %v538_v10 = vadd.f32 %v535_v9, %v231_v8 }
 0x138   :  { %540 = vst.msk [vmem:[#allocation2] sm:$0xff] %vm32_vm0, %v538_v10 }
 0x139   :  { %685 = shalt.err (!%p682_p4)
}
 0x13a   :  { %550 = dma.vmem_to_hbm [thread:$0]  %s548_s19, 128, %s1126_s5, [#allocation3]  }
 0x13b   :  { %694 = dma.done.wait [#allocation3], 128  }
 0x13c   :  { %695 = vsyncadd [#allocation3], 4294967168 }
 0x13d   :  { %554 = vsyncpa [#allocation3], 1 }

</bundles_post_ra>
